<compile_context>
chip_gen: v5e
topology: v5e:2x2
jax: 0.10.0
libtpu: 0.0.40
codegen_flags: <defaults>
</compile_context>

<pallas_src>
import jax
import jax.numpy as jnp
from jax import lax
from jax.experimental import pallas as pl
from jax.experimental.pallas import tpu as pltpu


def mlp_kernel(x_ref, w1_ref, b1_ref, w2_ref, b2_ref, o_ref):
    # x: (TB, D_in), w1: (H, D_in), b1: (1, H), w2: (D_out, H), b2: (1, D_out)
    x = x_ref[...]

    # First Linear: x @ W1^T  (contract dim 1 of x with dim 1 of w1) -> (TB, H)
    h = lax.dot_general(
        x, w1_ref[...],
        dimension_numbers=(((1,), (1,)), ((), ())),
        preferred_element_type=jnp.float32,
    )
    h = jax.nn.sigmoid(h + b1_ref[...])          # b1 broadcasts over batch rows

    # Second Linear: h @ W2^T -> (TB, D_out)
    y = lax.dot_general(
        h, w2_ref[...],
        dimension_numbers=(((1,), (1,)), ((), ())),
        preferred_element_type=jnp.float32,
    )
    o_ref[...] = jax.nn.sigmoid(y + b2_ref[...]).astype(o_ref.dtype)


def another_mlp_forward(x, w1, b1_2d, w2, b2_2d, batch_tile=512):
    """Forward pass of AnotherMLP.

    x:     (B, D_in)   f32
    w1:    (H, D_in)   f32  -- PyTorch nn.Linear layout (out, in)
    b1_2d: (1, H)      f32  -- bias reshaped once at init time
    w2:    (D_out, H)  f32
    b2_2d: (1, D_out)  f32
    """
    B, D_in = x.shape
    H = w1.shape[0]
    D_out = w2.shape[0]

    # Tile the batch axis (weights stay resident across grid steps).
    TB = min(B, batch_tile)
    pad = (-B) % TB
    if pad:
        x = jnp.pad(x, ((0, pad), (0, 0)))
    Bp = B + pad
    grid = (Bp // TB,)

    # Advisory cost for XLA's scheduler.
    flops = 2 * Bp * (D_in * H + H * D_out)
    transcendentals = Bp * (H + D_out)            # one exp per sigmoid output
    bytes_accessed = 4 * (Bp * D_in              # x
                          + H * D_in + H         # w1, b1
                          + D_out * H + D_out    # w2, b2
                          + Bp * D_out)          # output

    out = pl.pallas_call(
        mlp_kernel,
        out_shape=jax.ShapeDtypeStruct((Bp, D_out), x.dtype),
        grid=grid,
        in_specs=[
            pl.BlockSpec((TB, D_in), lambda i: (i, 0)),      # x: tiled over batch
            pl.BlockSpec((H, D_in), lambda i: (0, 0)),       # w1: resident
            pl.BlockSpec((1, H), lambda i: (0, 0)),          # b1: resident
            pl.BlockSpec((D_out, H), lambda i: (0, 0)),      # w2: resident
            pl.BlockSpec((1, D_out), lambda i: (0, 0)),      # b2: resident
        ],
        out_specs=pl.BlockSpec((TB, D_out), lambda i: (i, 0)),
        compiler_params=pltpu.CompilerParams(
            dimension_semantics=("parallel",),
        ),
        cost_estimate=pl.CostEstimate(
            flops=flops,
            transcendentals=transcendentals,
            bytes_accessed=bytes_accessed,
        ),
    )(x, w1, b1_2d, w2, b2_2d)

    return out[:B] if pad else out


if __name__ == "__main__":
    # Small shapes implied by the module: D_in=32, H=64, D_out=16, batch=8.
    B, D_in, H, D_out = 8, 32, 64, 16

    key = jax.random.PRNGKey(0)
    kx, kw1, kb1, kw2, kb2 = jax.random.split(key, 5)

    x = jax.random.normal(kx, (B, D_in), dtype=jnp.float32)

    # PyTorch nn.Linear-style init: weights (out, in); biases built directly in
    # the kernel-facing (1, out) layout so the forward path has no reshapes.
    bound1 = 1.0 / (D_in ** 0.5)
    w1 = jax.random.uniform(kw1, (H, D_in), minval=-bound1, maxval=bound1, dtype=jnp.float32)
    b1 = jax.random.uniform(kb1, (1, H), minval=-bound1, maxval=bound1, dtype=jnp.float32)
    bound2 = 1.0 / (H ** 0.5)
    w2 = jax.random.uniform(kw2, (D_out, H), minval=-bound2, maxval=bound2, dtype=jnp.float32)
    b2 = jax.random.uniform(kb2, (1, D_out), minval=-bound2, maxval=bound2, dtype=jnp.float32)

    forward = jax.jit(another_mlp_forward)
    out = jax.block_until_ready(forward(x, w1, b1, w2, b2))

    # Reference check in plain JAX (same math as the PyTorch module).
    ref = jax.nn.sigmoid(jax.nn.sigmoid(x @ w1.T + b1) @ w2.T + b2)
    assert out.shape == (B, D_out)
    assert jnp.allclose(out, ref, atol=1e-5, rtol=1e-5)

    print("KERNEL_OK")
</pallas_src>

<mosaic_0001>
module attributes {stable_mosaic.version = 11 : i64} {
  func.func @mlp_kernel(%arg0: i32, %arg1: memref<8x32xf32, #tpu.memory_space<vmem>>, %arg2: memref<64x32xf32, #tpu.memory_space<vmem>>, %arg3: memref<1x64xf32, #tpu.memory_space<vmem>>, %arg4: memref<16x64xf32, #tpu.memory_space<vmem>>, %arg5: memref<1x16xf32, #tpu.memory_space<vmem>>, %arg6: memref<8x16xf32, #tpu.memory_space<vmem>>) attributes {dimension_semantics = [#tpu.dimension_semantics<parallel>], iteration_bounds = array<i64: 1>, scalar_prefetch = 0 : i64, scratch_operands = 0 : i64, tpu.core_type = #tpu.core_type<tc>, window_params = [{transform_indices = @transform_0, window_bounds = array<i64: 8, 32>}, {pipeline_mode = #tpu.pipeline_mode<synchronous>, transform_indices = @transform_1, window_bounds = array<i64: 64, 32>}, {pipeline_mode = #tpu.pipeline_mode<synchronous>, transform_indices = @transform_2, window_bounds = array<i64: 1, 64>}, {pipeline_mode = #tpu.pipeline_mode<synchronous>, transform_indices = @transform_3, window_bounds = array<i64: 16, 64>}, {pipeline_mode = #tpu.pipeline_mode<synchronous>, transform_indices = @transform_4, window_bounds = array<i64: 1, 16>}, {transform_indices = @transform_5, window_bounds = array<i64: 8, 16>}]} {
    %c0 = arith.constant 0 : index
    %c0_0 = arith.constant 0 : index
    %0 = vector.load %arg1[%c0, %c0_0] : memref<8x32xf32, #tpu.memory_space<vmem>>, vector<8x32xf32>
    %c0_1 = arith.constant 0 : index
    %c0_2 = arith.constant 0 : index
    %1 = vector.load %arg2[%c0_1, %c0_2] : memref<64x32xf32, #tpu.memory_space<vmem>>, vector<64x32xf32>
    %cst = arith.constant dense<0.000000e+00> : vector<8x64xf32>
    %2 = tpu.matmul %0, %1, %cst {dimension_numbers = #tpu.dot_dimension_numbers<[1], [1], [0], [0], [0, 0, 1, 0], [], []>} : vector<8x32xf32>, vector<64x32xf32>, vector<8x64xf32> -> vector<8x64xf32>
    %c0_3 = arith.constant 0 : index
    %c0_4 = arith.constant 0 : index
    %3 = vector.load %arg3[%c0_3, %c0_4] : memref<1x64xf32, #tpu.memory_space<vmem>>, vector<1x64xf32>
    %4 = vector.broadcast %3 : vector<1x64xf32> to vector<8x64xf32>
    %5 = arith.addf %2, %4 : vector<8x64xf32>
    %6 = arith.negf %5 : vector<8x64xf32>
    %7 = math.exp %6 : vector<8x64xf32>
    %cst_5 = arith.constant 1.000000e+00 : f32
    %8 = vector.broadcast %cst_5 : f32 to vector<8x64xf32>
    %9 = arith.addf %8, %7 : vector<8x64xf32>
    %10 = arith.divf %8, %9 : vector<8x64xf32>
    %c0_6 = arith.constant 0 : index
    %c0_7 = arith.constant 0 : index
    %11 = vector.load %arg4[%c0_6, %c0_7] : memref<16x64xf32, #tpu.memory_space<vmem>>, vector<16x64xf32>
    %cst_8 = arith.constant dense<0.000000e+00> : vector<8x16xf32>
    %12 = tpu.matmul %10, %11, %cst_8 {dimension_numbers = #tpu.dot_dimension_numbers<[1], [1], [0], [0], [0, 0, 1, 0], [], []>} : vector<8x64xf32>, vector<16x64xf32>, vector<8x16xf32> -> vector<8x16xf32>
    %c0_9 = arith.constant 0 : index
    %c0_10 = arith.constant 0 : index
    %13 = vector.load %arg5[%c0_9, %c0_10] : memref<1x16xf32, #tpu.memory_space<vmem>>, vector<1x16xf32>
    %14 = vector.broadcast %13 : vector<1x16xf32> to vector<8x16xf32>
    %15 = arith.addf %12, %14 : vector<8x16xf32>
    %16 = arith.negf %15 : vector<8x16xf32>
    %17 = math.exp %16 : vector<8x16xf32>
    %cst_11 = arith.constant 1.000000e+00 : f32
    %18 = vector.broadcast %cst_11 : f32 to vector<8x16xf32>
    %19 = arith.addf %18, %17 : vector<8x16xf32>
    %20 = arith.divf %18, %19 : vector<8x16xf32>
    %c0_12 = arith.constant 0 : index
    %c0_13 = arith.constant 0 : index
    %21 = vector.load %arg6[%c0_12, %c0_13] : memref<8x16xf32, #tpu.memory_space<vmem>>, vector<8x16xf32>
    tpu.vector_store %arg6[%c0_12, %c0_13], %20 {strides = array<i32>} : memref<8x16xf32, #tpu.memory_space<vmem>>, vector<8x16xf32>,
    return
  }
  func.func @transform_0(%arg0: i32) -> (i32, i32) {
    %c0_i32 = arith.constant 0 : i32
    %c0_i32_0 = arith.constant 0 : i32
    return %arg0, %c0_i32 : i32, i32
  }
  func.func @transform_1(%arg0: i32) -> (i32, i32) {
    %c0_i32 = arith.constant 0 : i32
    %c0_i32_0 = arith.constant 0 : i32
    %c0_i32_1 = arith.constant 0 : i32
    return %c0_i32, %c0_i32_0 : i32, i32
  }
  func.func @transform_2(%arg0: i32) -> (i32, i32) {
    %c0_i32 = arith.constant 0 : i32
    %c0_i32_0 = arith.constant 0 : i32
    %c0_i32_1 = arith.constant 0 : i32
    return %c0_i32, %c0_i32_0 : i32, i32
  }
  func.func @transform_3(%arg0: i32) -> (i32, i32) {
    %c0_i32 = arith.constant 0 : i32
    %c0_i32_0 = arith.constant 0 : i32
    %c0_i32_1 = arith.constant 0 : i32
    return %c0_i32, %c0_i32_0 : i32, i32
  }
  func.func @transform_4(%arg0: i32) -> (i32, i32) {
    %c0_i32 = arith.constant 0 : i32
    %c0_i32_0 = arith.constant 0 : i32
    %c0_i32_1 = arith.constant 0 : i32
    return %c0_i32, %c0_i32_0 : i32, i32
  }
  func.func @transform_5(%arg0: i32) -> (i32, i32) {
    %c0_i32 = arith.constant 0 : i32
    %c0_i32_0 = arith.constant 0 : i32
    return %arg0, %c0_i32 : i32, i32
  }
}

</mosaic_0001>

<bundles_post_ra>
// kernel: another_mlp_forward.1
= control target key start
LH: loop header
LB: loop body
LE: loop exit
PB: predicated region body
PF: predicated region fallthrough
CT: control target
= control target key end

     0   :  { %vm34_vm0 = vcmask 261120   ;;  %s310_s0 = inlined_call_operand.vmem [shape: f32[8,32], index: 0, kind: input, shape index: {}]   ;;  %s311_s1 = inlined_call_operand.vmem [shape: f32[64,32], index: 1, kind: input, shape index: {}]   ;;  %s312_s2 = inlined_call_operand.vmem [shape: f32[1,64], index: 2, kind: input, shape index: {}]   ;;  %s313_s3 = inlined_call_operand.vmem [shape: f32[16,64], index: 3, kind: input, shape index: {}]   ;;  %s314_s4 = inlined_call_operand.vmem [shape: f32[1,16], index: 4, kind: input, shape index: {}]   ;;  %s315_s5 = inlined_call_operand.hbm [shape: f32[8,16], index: 5, kind: output, shape index: {}]  }
   0x1   :  { %v29_v0 = vld [vmem:[%s311_s1 + $0x38] sm:$0xff]  ;;  %v28_v1 = vld [vmem:[%s311_s1 + $0x30] sm:$0xff] }
   0x2   :  { %174 = vmatpush.xpose.msk.msra.mxu0 %vm34_vm0, %v29_v0 }
   0x3   :  { %10 = vsyncpa [#allocation3], 0  ;;  %v27_v2 = vld [vmem:[%s311_s1 + $0x28] sm:$0xff]  ;;  %v26_v3 = vld [vmem:[%s311_s1 + $0x20] sm:$0xff]  ;;  %vm107_vm1 = vcmask 523264   ;;  %vm156_vm9 = vcmask 130048  }
   0x4   :  { %v25_v4 = vld [vmem:[%s311_s1 + $0x18] sm:$0xff]  ;;  %v24_v5 = vld [vmem:[%s311_s1 + $0x10] sm:$0xff]  ;;  %v23_v6 = vld [vmem:[%s311_s1 + $0x8] sm:$0xff] }
   0x5   :  { %v22_v7 = vld [vmem:[%s311_s1] sm:$0xff]  ;;  %v102_v9 = vld [vmem:[%s313_s3 + $0x8] sm:$0xff] }
   0x6   :  { %175 = vmatpush.xpose.msk.msra.mxu0 %vm34_vm0, %v28_v1  ;;  %v21_v8 = vld [vmem:[%s310_s0] sm:$0xff]  ;;  %184 = vmatpush.xpose.msk.msra.mxu1 %vm107_vm1, %v102_v9 }
   0x7   :  { %v101_v10 = vld [vmem:[%s313_s3] sm:$0xff]  ;;  %s225_s3 = smov [#allocation2]  }
   0x8   :  { %v189_v11 = vld [vmem:[%s312_s2] ss:$0 sm:$0xff]  ;;  %s163_s16 = sshll.u32 %s225_s3, 4  ;;  %s164_s16 = int_to_ptr.vmem [resolvable:$true] %s163_s16 }
   0x9   :  { %v190_v27 = vld [vmem:[%s314_s4] ss:$0 sm:$0xff]  ;;  %s165_s4 = sshll.u32 %s315_s5, 4  ;;  %s166_s4 = int_to_ptr.hbm [resolvable:$true] %s165_s4 }
   0xa   :  { %176 = vmatpush.xpose.msk.msra.mxu0 %vm34_vm0, %v27_v2  ;;  %185 = vmatpush.xpose.msk.msra.mxu1 %vm107_vm1, %v101_v10 }
   0xe   :  { %177 = vmatpush.xpose.msk.msra.mxu0 %vm34_vm0, %v26_v3 }
  0x12   :  { %178 = vmatpush.xpose.msk.msra.mxu0 %vm34_vm0, %v25_v4 }
  0x16   :  { %179 = vmatpush.xpose.msk.msra.mxu0 %vm34_vm0, %v24_v5 }
  0x1a   :  { %180 = vmatpush.xpose.msk.msra.mxu0 %vm34_vm0, %v23_v6 }
  0x1e   :  { %181 = vmatpush.xpose.msk.msra.mxu0 %vm34_vm0, %v22_v7 }
  0x21   :  { %182 = vmatmul.msk.f32.vlgmr.msra.gmra.mxu0 %vm34_vm0, %v21_v8 }
  0x9e   :  { %v79_v12 = vpop.f32.mrf.mxu0 }
  0x9f   :  { %v80_v13 = vadd.f32 %v189_v11, %v79_v12 }
  0xa1   :  { %v183_v14 = vmul.f32 -1.442695, %v80_v13 }
  0xa3   :  { %191 = vpow2.f32 %v183_v14 }
  0xa9   :  { %v192_v15 = vpop.eup %191 }
  0xaa   :  { %v85_v16 = vadd.f32 1.0, %v192_v15 }
  0xac   :  { %193 = vrcp.f32 %v85_v16  ;;  %v97_v20 = vand.u32 2147483648, %v85_v16  ;;  %v95_v22 = vand.u32 2147483647, %v85_v16  ;;  %vm91_vm3 = vweird.f32 %v85_v16 }
  0xae   :  { %v98_v24 = vor.u32 1.1754944e-38, %v97_v20  ;;  %vm96_vm5 = vcmp.eq.f32.partialorder %v95_v22, 8.507059e+37 }
  0xb2   :  { %v194_v17 = vpop.eup %193 }
  0xb3   :  { %v87_v18 = vmul.f32 %v194_v17, %v85_v16  ;;  %vm92_vm2 = vweird.f32 %v194_v17 }
  0xb4   :  { %vm93_vm4 = vmor %vm91_vm3, %vm92_vm2 }
  0xb5   :  { %v88_v19 = vsub.f32 1.0, %v87_v18 }
  0xb7   :  { %v89_v21 = vmul.f32 %v194_v17, %v88_v19 }
  0xb9   :  { %v90_v23 = vadd.f32 %v194_v17, %v89_v21 }
  0xbb   :  { %v94_v25 = vsel %vm93_vm4, %v194_v17, %v90_v23 }
  0xbc   :  { %v99_v26 = vsel %vm96_vm5, %v98_v24, %v94_v25 }
  0xbd   :  { %186 = vmatmul.msk.f32.vlgmr.msra.gmra.mxu1 %vm107_vm1, %v99_v26 }
 0x13a   :  { %v134_v28 = vpop.f32.mrf.mxu1 }
 0x13b   :  { %v135_v29 = vadd.f32 %v190_v27, %v134_v28 }
 0x13d   :  { %v187_v30 = vmul.f32 -1.442695, %v135_v29 }
 0x13f   :  { %195 = vpow2.f32 %v187_v30 }
 0x145   :  { %v196_v31 = vpop.eup %195 }
 0x146   :  { %v140_v32 = vadd.f32 1.0, %v196_v31 }
 0x148   :  { %197 = vrcp.f32 %v140_v32  ;;  %v152_v36 = vand.u32 2147483648, %v140_v32  ;;  %v150_v38 = vand.u32 2147483647, %v140_v32  ;;  %vm146_vm7 = vweird.f32 %v140_v32 }
 0x14a   :  { %v153_v40 = vor.u32 1.1754944e-38, %v152_v36  ;;  %vm151_vm10 = vcmp.eq.f32.partialorder %v150_v38, 8.507059e+37 }
 0x14e   :  { %v198_v33 = vpop.eup %197 }
 0x14f   :  { %v142_v34 = vmul.f32 %v198_v33, %v140_v32  ;;  %vm147_vm6 = vweird.f32 %v198_v33 }
 0x150   :  { %vm148_vm8 = vmor %vm146_vm7, %vm147_vm6 }
 0x151   :  { %v143_v35 = vsub.f32 1.0, %v142_v34 }
 0x153   :  { %v144_v37 = vmul.f32 %v198_v33, %v143_v35 }
 0x155   :  { %v145_v39 = vadd.f32 %v198_v33, %v144_v37 }
 0x157   :  { %v149_v41 = vsel %vm148_vm8, %v198_v33, %v145_v39 }
 0x158   :  { %v154_v42 = vsel %vm151_vm10, %v153_v40, %v149_v41 }
 0x159   :  { %157 = vst.msk [vmem:[#allocation2] sm:$0xff] %vm156_vm9, %v154_v42 }
 0x15a   :  { %168 = dma.vmem_to_hbm [thread:$0]  %s164_s16, 128, %s166_s4, [#allocation3]  }
 0x15b   :  { %223 = dma.done.wait [#allocation3], 128  }
 0x15c   :  { %224 = vsyncadd [#allocation3], 4294967168 }
 0x15d   :  { %173 = vsyncpa [#allocation3], 1 }

</bundles_post_ra>
